<compile_context>
chip_gen: v7x
topology: tpu7x:2x2x1
jax: 0.10.0
libtpu: 0.0.40
codegen_flags: <defaults>
</compile_context>

<pallas_src>
import functools

import jax
import jax.numpy as jnp
import numpy as np
from jax.experimental import pallas as pl
from jax.experimental.pallas import tpu as pltpu


# ----------------------------------------------------------------------------
# In-kernel helpers
# ----------------------------------------------------------------------------
def _erf(x):
    # Abramowitz-Stegun 7.1.26 polynomial (|err| < 1.5e-7).
    a1, a2, a3, a4, a5 = 0.254829592, -0.284496736, 1.421413741, -1.453152027, 1.061405429
    p = 0.3275911
    s = jnp.where(x >= 0.0, 1.0, -1.0)
    ax = jnp.abs(x)
    t = 1.0 / (1.0 + p * ax)
    poly = ((((a5 * t + a4) * t + a3) * t + a2) * t + a1) * t
    return s * (1.0 - poly * jnp.exp(-ax * ax))


def _gelu(x):
    return 0.5 * x * (1.0 + _erf(x * 0.7071067811865476))


# ----------------------------------------------------------------------------
# Kernel 1: Conv (im2col matmul on MXU) fused with BN-moment / pooling epilogue
#   p_ref : (tb, P, K)   patches for tb frames (compute dtype, e.g. bf16)
#   w_ref : (K, C)       flattened conv weight (compute dtype)
#   b_ref : (1, C)       conv bias (f32)
#   outputs (all f32, per frame): sum, sum-of-squares, max, min over P
# ----------------------------------------------------------------------------
def conv_stats_kernel(p_ref, w_ref, b_ref, s1_ref, s2_ref, mx_ref, mn_ref):
    tb, P, K = p_ref.shape
    C = w_ref.shape[1]
    p = p_ref[...].reshape(tb * P, K)                       # big MXU tile
    acc = jnp.dot(p, w_ref[...], preferred_element_type=jnp.float32)  # (tb*P, C) f32
    y = acc + b_ref[...]                                    # conv bias, f32
    y3 = y.reshape(tb, P, C)
    s1_ref[...] = jnp.sum(y3, axis=1)                       # (tb, C)
    s2_ref[...] = jnp.sum(y3 * y3, axis=1)
    mx_ref[...] = jnp.max(y3, axis=1)
    mn_ref[...] = jnp.min(y3, axis=1)


# ----------------------------------------------------------------------------
# Kernel 2: head — BN finalize + pooled features -> LN/Linear/GELU -> split ->
#           MLP -> per-batch min-max norm.  Works on (BT, C) stats only.
# ----------------------------------------------------------------------------
def head_kernel(B, T, P,
                s1_ref, s2_ref, mx_ref, mn_ref,
                bn_g_ref, bn_b_ref,
                ln_ga_ref, ln_gb_ref, ln_ba_ref, ln_bb_ref,
                w1al_ref, w1ag_ref, w1bl_ref, w1bg_ref, b1l_ref, b1g_ref,
                w2a_ref, w2b_ref, b2_ref,
                w3_ref, b3_ref, w4_ref, b4_ref,
                out_ref):
    BT, C = s1_ref.shape
    N = BT * P
    E = 2 * C

    s1 = s1_ref[...]
    s2 = s2_ref[...]

    # BatchNorm3d (training-mode batch stats), finalized from per-frame sums.
    tot1 = jnp.sum(s1, axis=0, keepdims=True)               # (1, C)
    tot2 = jnp.sum(s2, axis=0, keepdims=True)
    mean = tot1 * (1.0 / N)
    var = tot2 * (1.0 / N) - mean * mean                    # biased, like torch BN
    scale = bn_g_ref[...] * jax.lax.rsqrt(var + 1e-5)       # (1, C)
    shift = bn_b_ref[...] - mean * scale

    # avg pool of BN(y) = affine of the pre-BN per-frame mean.
    avg = (s1 * (1.0 / P)) * scale + shift                  # (BT, C)
    # max pool of BN(y): per-channel affine -> pick max or min by sign(scale).
    mxp = jnp.where(scale >= 0.0, mx_ref[...] * scale, mn_ref[...] * scale) + shift

    # LayerNorm over the (avg ++ max) concat, computed from the two halves
    # (no in-kernel concatenation).
    mu = (jnp.sum(avg, -1, keepdims=True) + jnp.sum(mxp, -1, keepdims=True)) * (1.0 / E)
    da = avg - mu
    db = mxp - mu
    sg = (jnp.sum(da * da, -1, keepdims=True) + jnp.sum(db * db, -1, keepdims=True)) * (1.0 / E)
    rstd = jax.lax.rsqrt(sg + 1e-5)
    na = da * rstd * ln_ga_ref[...] + ln_ba_ref[...]        # (BT, C)
    nb = db * rstd * ln_gb_ref[...] + ln_bb_ref[...]        # (BT, C)

    dot = lambda a, w: jnp.dot(a, w, preferred_element_type=jnp.float32)

    # in_conv Linear with weights pre-split into (avg/max rows) x (local/global cols)
    h1_loc = _gelu(dot(na, w1al_ref[...]) + dot(nb, w1bl_ref[...]) + b1l_ref[...])  # (BT, C)
    h1_glb = _gelu(dot(na, w1ag_ref[...]) + dot(nb, w1bg_ref[...]) + b1g_ref[...])  # (BT, C)

    # Global branch: mean over tokens, matmul once per batch element (B rows),
    # then broadcast across T (saves T x redundant matmul rows).
    gmean = jnp.mean(h1_glb.reshape(B, T, C), axis=1)       # (B, C)
    gctr = dot(gmean, w2b_ref[...])                         # (B, C)   (E/2 == C)
    gb = jnp.broadcast_to(gctr.reshape(B, 1, C), (B, T, C)).reshape(BT, C)

    # out_conv MLP
    h2 = _gelu(dot(h1_loc, w2a_ref[...]) + gb + b2_ref[...])            # (BT, C)
    h3 = _gelu(dot(h2, w3_ref[...]) + b3_ref[...])                      # (BT, C/2)
    s = jnp.sum(h3 * w4_ref[...], axis=-1, keepdims=True) + b4_ref[...]  # (BT, 1)

    # min_max_norm over the token axis per batch element.
    s = s.reshape(B, T, 1)
    smin = jnp.min(s, axis=1, keepdims=True)
    smax = jnp.max(s, axis=1, keepdims=True)
    out_ref[...] = (s - smin) / (smax - smin + 1e-5)


def _zero_idx(i, nd):
    return (0,) * nd


def _pick_tb(BT, P, target_rows=512):
    """Largest divisor of BT keeping tb*P near an MXU-friendly row count,
    preferring tb that keeps the (tb, C) stat blocks 8-sublane aligned."""
    divs = [d for d in range(1, BT + 1) if BT % d == 0]
    ok = [d for d in divs if d * P <= max(target_rows, P)]
    aligned = [d for d in ok if d == BT or d % 8 == 0]
    if aligned:
        return max(aligned)
    return max(ok) if ok else 1


def _vmem_limit(byte_count, cap=64 << 20, floor=4 << 20):
    b = int(np.ceil(byte_count / float(1 << 20))) << 20
    return int(min(cap, max(floor, b)))


# ----------------------------------------------------------------------------
# Wrapper
# ----------------------------------------------------------------------------
def scorenet_forward(x_ncthw, params, compute_dtype=jnp.bfloat16):
    B, C, T, H, W = x_ncthw.shape
    x = jnp.transpose(x_ncthw, (0, 2, 3, 4, 1)).astype(compute_dtype)  # (B,T,H,W,C)

    kh = kw = 3
    sh = sw = 2
    Ho = (H - kh) // sh + 1
    Wo = (W - kw) // sw + 1

    # im2col (XLA glue), emitted directly in the compute dtype.
    cols = []
    for i in range(kh):
        for j in range(kw):
            cols.append(x[:, :, i:i + sh * Ho:sh, j:j + sw * Wo:sw, :])
    patches = jnp.stack(cols, axis=-2)                      # (B, T, Ho, Wo, 9, C)
    BT, P, K = B * T, Ho * Wo, kh * kw * C
    patches = patches.reshape(BT, P, K)

    # Conv3d weight (Cout, Cin, 1, kh, kw) -> (kh*kw*Cin, Cout).
    w_flat = jnp.transpose(params['conv_w'][:, :, 0], (2, 3, 1, 0)) \
                .reshape(K, C).astype(compute_dtype)
    conv_b = params['conv_b'].reshape(1, C).astype(jnp.float32)

    tb = _pick_tb(BT, P)
    esz = jnp.dtype(compute_dtype).itemsize
    conv_vmem = _vmem_limit(
        2 * (tb * P * K * esz + K * C * esz + C * 4 + 4 * tb * C * 4)
        + 4 * tb * P * C * 4 + (2 << 20))

    stat_shape = jax.ShapeDtypeStruct((BT, C), jnp.float32)
    s1, s2, mx, mn = pl.pallas_call(
        conv_stats_kernel,
        out_shape=(stat_shape, stat_shape, stat_shape, stat_shape),
        grid=(BT // tb,),
        in_specs=[
            pl.BlockSpec((tb, P, K), lambda i: (i, 0, 0)),
            pl.BlockSpec((K, C), lambda i: (0, 0)),
            pl.BlockSpec((1, C), lambda i: (0, 0)),
        ],
        out_specs=[pl.BlockSpec((tb, C), lambda i: (i, 0)) for _ in range(4)],
        compiler_params=pltpu.CompilerParams(
            dimension_semantics=("parallel",),      # megacore-shardable on v7x
            vmem_limit_bytes=conv_vmem),
    )(patches, w_flat, conv_b)

    # ---- head: pre-split weights so the kernel never concatenates ----------
    E = 2 * C
    f32 = lambda a: a.astype(jnp.float32)
    w1, b1 = f32(params['w1']), f32(params['b1'])
    w2, b2 = f32(params['w2']), f32(params['b2'])
    head_args = (
        s1, s2, mx, mn,
        f32(params['bn_g']).reshape(1, C), f32(params['bn_b']).reshape(1, C),
        f32(params['ln_g'][:C]).reshape(1, C), f32(params['ln_g'][C:]).reshape(1, C),
        f32(params['ln_b'][:C]).reshape(1, C), f32(params['ln_b'][C:]).reshape(1, C),
        w1[:C, :C], w1[:C, C:], w1[C:, :C], w1[C:, C:],
        b1[:C].reshape(1, C), b1[C:].reshape(1, C),
        w2[:C], w2[C:], b2.reshape(1, -1),
        f32(params['w3']), f32(params['b3']).reshape(1, -1),
        f32(params['w4']).reshape(1, -1), jnp.reshape(f32(params['b4']), (1, 1)),
    )
    in_specs = [pl.BlockSpec(a.shape, functools.partial(_zero_idx, nd=a.ndim))
                for a in head_args]
    head_bytes = sum(int(np.prod(a.shape)) * a.dtype.itemsize for a in head_args)
    head_vmem = _vmem_limit(4 * head_bytes + B * T * 4 + (2 << 20))

    score = pl.pallas_call(
        functools.partial(head_kernel, B, T, P),
        out_shape=jax.ShapeDtypeStruct((B, T, 1), jnp.float32),
        grid=(1,),
        in_specs=in_specs,
        out_specs=pl.BlockSpec((B, T, 1), lambda i: (0, 0, 0)),
        compiler_params=pltpu.CompilerParams(
            dimension_semantics=("arbitrary",),
            vmem_limit_bytes=head_vmem),
    )(*head_args)

    return score[..., 0]                                    # (B, T)


# ----------------------------------------------------------------------------
# Pure-JAX reference (independent path: lax conv + jax.nn.gelu exact, f32)
# ----------------------------------------------------------------------------
def reference_forward(x_ncthw, p):
    B, C, T, H, W = x_ncthw.shape
    x2 = jnp.transpose(x_ncthw, (0, 2, 1, 3, 4)).reshape(B * T, C, H, W)
    y = jax.lax.conv_general_dilated(
        x2, p['conv_w'][:, :, 0], (2, 2), 'VALID',
        dimension_numbers=('NCHW', 'OIHW', 'NCHW'))
    y = y + p['conv_b'][None, :, None, None]
    mean = y.mean(axis=(0, 2, 3), keepdims=True)
    var = ((y - mean) ** 2).mean(axis=(0, 2, 3), keepdims=True)
    y = (y - mean) / jnp.sqrt(var + 1e-5)
    y = y * p['bn_g'][None, :, None, None] + p['bn_b'][None, :, None, None]
    Ho, Wo = y.shape[2], y.shape[3]
    y = jnp.transpose(y, (0, 2, 3, 1)).reshape(B, T, Ho * Wo, C)
    avg = y.mean(axis=2)
    mx = y.max(axis=2)
    h = jnp.concatenate([avg, mx], axis=-1)
    mu = h.mean(-1, keepdims=True)
    sg = ((h - mu) ** 2).mean(-1, keepdims=True)
    hn = (h - mu) / jnp.sqrt(sg + 1e-5) * p['ln_g'] + p['ln_b']
    h1 = jax.nn.gelu(hn @ p['w1'] + p['b1'], approximate=False)
    E = h1.shape[-1]
    local = h1[..., :E // 2]
    glob = h1[..., E // 2:].mean(axis=1, keepdims=True)
    h2in = jnp.concatenate([local, jnp.broadcast_to(glob, local.shape)], axis=-1)
    h2 = jax.nn.gelu(h2in @ p['w2'] + p['b2'], approximate=False)
    h3 = jax.nn.gelu(h2 @ p['w3'] + p['b3'], approximate=False)
    s = (h3 @ p['w4'])[..., 0] + p['b4']
    smin = s.min(-1, keepdims=True)
    smax = s.max(-1, keepdims=True)
    return (s - smin) / (smax - smin + 1e-5)


# ----------------------------------------------------------------------------
# Deterministic parameter init (synthetic; shapes follow ScoreNet.__init__)
# ----------------------------------------------------------------------------
def init_params(key, embed_dim=16):
    E = embed_dim * 2          # "embed_dim *= 2" in __init__
    C = E // 2                 # Conv3d / BatchNorm3d channel count
    ks = jax.random.split(key, 16)

    def n(k, shape, scale):
        return (scale * jax.random.normal(k, shape)).astype(jnp.float32)

    return dict(
        conv_w=n(ks[0], (C, C, 1, 3, 3), 1.0 / np.sqrt(C * 9)),
        conv_b=n(ks[1], (C,), 0.02),
        bn_g=(1.0 + 0.1 * jax.random.normal(ks[2], (C,))).astype(jnp.float32),
        bn_b=n(ks[3], (C,), 0.1),
        ln_g=(1.0 + 0.1 * jax.random.normal(ks[4], (E,))).astype(jnp.float32),
        ln_b=n(ks[5], (E,), 0.1),
        w1=n(ks[6], (E, E), 1.0 / np.sqrt(E)),
        b1=n(ks[7], (E,), 0.02),
        w2=n(ks[8], (E, E // 2), 1.0 / np.sqrt(E)),
        b2=n(ks[9], (E // 2,), 0.02),
        w3=n(ks[10], (E // 2, E // 4), 1.0 / np.sqrt(E // 2)),
        b3=n(ks[11], (E // 4,), 0.02),
        w4=n(ks[12], (E // 4, 1), 1.0 / np.sqrt(E // 4)),
        b4=n(ks[13], (), 0.02),
    )


if __name__ == "__main__":
    key = jax.random.PRNGKey(0)
    pkey, xkey = jax.random.split(key)

    embed_dim = 16                       # module default is 384; small demo size
    params = init_params(pkey, embed_dim)

    B, C, T, H, W = 2, embed_dim, 4, 9, 9   # NCDHW, as PyTorch Conv3d expects
    x = jax.random.normal(xkey, (B, C, T, H, W), dtype=jnp.float32)

    ref = jax.block_until_ready(reference_forward(x, params))

    # f32 path: exact-semantics check.
    out_f32 = jax.block_until_ready(
        scorenet_forward(x, params, compute_dtype=jnp.float32))
    np.testing.assert_allclose(np.asarray(out_f32), np.asarray(ref),
                               rtol=5e-3, atol=5e-3)

    # bf16 fast path (conv matmul operands bf16, f32 accumulation/stats).
    out_bf16 = jax.block_until_ready(
        scorenet_forward(x, params, compute_dtype=jnp.bfloat16))
    np.testing.assert_allclose(np.asarray(out_bf16), np.asarray(ref),
                               rtol=5e-2, atol=5e-2)

    print("KERNEL_OK")
</pallas_src>

<mosaic_0001>
module attributes {stable_mosaic.version = 11 : i64} {
  func.func @conv_stats_kernel(%arg0: i32, %arg1: memref<8x16x144xf32, #tpu.memory_space<vmem>>, %arg2: memref<144x16xf32, #tpu.memory_space<vmem>>, %arg3: memref<1x16xf32, #tpu.memory_space<vmem>>, %arg4: memref<8x16xf32, #tpu.memory_space<vmem>>, %arg5: memref<8x16xf32, #tpu.memory_space<vmem>>, %arg6: memref<8x16xf32, #tpu.memory_space<vmem>>, %arg7: memref<8x16xf32, #tpu.memory_space<vmem>>) attributes {dimension_semantics = [#tpu.dimension_semantics<parallel>], iteration_bounds = array<i64: 1>, scalar_prefetch = 0 : i64, scratch_operands = 0 : i64, tpu.core_type = #tpu.core_type<tc>, window_params = [{transform_indices = @transform_0, window_bounds = array<i64: 8, 16, 144>}, {pipeline_mode = #tpu.pipeline_mode<synchronous>, transform_indices = @transform_1, window_bounds = array<i64: 144, 16>}, {pipeline_mode = #tpu.pipeline_mode<synchronous>, transform_indices = @transform_2, window_bounds = array<i64: 1, 16>}, {transform_indices = @transform_3, window_bounds = array<i64: 8, 16>}, {transform_indices = @transform_4, window_bounds = array<i64: 8, 16>}, {transform_indices = @transform_5, window_bounds = array<i64: 8, 16>}, {transform_indices = @transform_6, window_bounds = array<i64: 8, 16>}]} {
    %c0 = arith.constant 0 : index
    %c0_0 = arith.constant 0 : index
    %c0_1 = arith.constant 0 : index
    %0 = vector.load %arg1[%c0, %c0_0, %c0_1] : memref<8x16x144xf32, #tpu.memory_space<vmem>>, vector<8x16x144xf32>
    %1 = vector.shape_cast %0 : vector<8x16x144xf32> to vector<128x144xf32>
    %c0_2 = arith.constant 0 : index
    %c0_3 = arith.constant 0 : index
    %2 = vector.load %arg2[%c0_2, %c0_3] : memref<144x16xf32, #tpu.memory_space<vmem>>, vector<144x16xf32>
    %cst = arith.constant dense<0.000000e+00> : vector<128x16xf32>
    %3 = tpu.matmul %1, %2, %cst {dimension_numbers = #tpu.dot_dimension_numbers<[1], [0], [0], [1], [0, 0, 1, 1], [], []>} : vector<128x144xf32>, vector<144x16xf32>, vector<128x16xf32> -> vector<128x16xf32>
    %c0_4 = arith.constant 0 : index
    %c0_5 = arith.constant 0 : index
    %4 = vector.load %arg3[%c0_4, %c0_5] : memref<1x16xf32, #tpu.memory_space<vmem>>, vector<1x16xf32>
    %5 = vector.broadcast %4 : vector<1x16xf32> to vector<128x16xf32>
    %6 = arith.addf %3, %5 : vector<128x16xf32>
    %7 = vector.shape_cast %6 : vector<128x16xf32> to vector<8x16x16xf32>
    %cst_6 = arith.constant dense<0.000000e+00> : vector<8x16xf32>
    %8 = vector.multi_reduction <add>, %7, %cst_6 [1] : vector<8x16x16xf32> to vector<8x16xf32>
    %c0_7 = arith.constant 0 : index
    %c0_8 = arith.constant 0 : index
    %9 = vector.load %arg4[%c0_7, %c0_8] : memref<8x16xf32, #tpu.memory_space<vmem>>, vector<8x16xf32>
    tpu.vector_store %arg4[%c0_7, %c0_8], %8 {strides = array<i32>} : memref<8x16xf32, #tpu.memory_space<vmem>>, vector<8x16xf32>,
    %10 = arith.mulf %7, %7 : vector<8x16x16xf32>
    %cst_9 = arith.constant dense<0.000000e+00> : vector<8x16xf32>
    %11 = vector.multi_reduction <add>, %10, %cst_9 [1] : vector<8x16x16xf32> to vector<8x16xf32>
    %c0_10 = arith.constant 0 : index
    %c0_11 = arith.constant 0 : index
    %12 = vector.load %arg5[%c0_10, %c0_11] : memref<8x16xf32, #tpu.memory_space<vmem>>, vector<8x16xf32>
    tpu.vector_store %arg5[%c0_10, %c0_11], %11 {strides = array<i32>} : memref<8x16xf32, #tpu.memory_space<vmem>>, vector<8x16xf32>,
    %cst_12 = arith.constant dense<0xFF800000> : vector<8x16xf32>
    %13 = vector.multi_reduction <maximumf>, %7, %cst_12 [1] : vector<8x16x16xf32> to vector<8x16xf32>
    %c0_13 = arith.constant 0 : index
    %c0_14 = arith.constant 0 : index
    %14 = vector.load %arg6[%c0_13, %c0_14] : memref<8x16xf32, #tpu.memory_space<vmem>>, vector<8x16xf32>
    tpu.vector_store %arg6[%c0_13, %c0_14], %13 {strides = array<i32>} : memref<8x16xf32, #tpu.memory_space<vmem>>, vector<8x16xf32>,
    %cst_15 = arith.constant dense<0x7F800000> : vector<8x16xf32>
    %15 = vector.multi_reduction <minimumf>, %7, %cst_15 [1] : vector<8x16x16xf32> to vector<8x16xf32>
    %c0_16 = arith.constant 0 : index
    %c0_17 = arith.constant 0 : index
    %16 = vector.load %arg7[%c0_16, %c0_17] : memref<8x16xf32, #tpu.memory_space<vmem>>, vector<8x16xf32>
    tpu.vector_store %arg7[%c0_16, %c0_17], %15 {strides = array<i32>} : memref<8x16xf32, #tpu.memory_space<vmem>>, vector<8x16xf32>,
    return
  }
  func.func @transform_0(%arg0: i32) -> (i32, i32, i32) {
    %c0_i32 = arith.constant 0 : i32
    %c0_i32_0 = arith.constant 0 : i32
    %c0_i32_1 = arith.constant 0 : i32
    return %arg0, %c0_i32, %c0_i32_0 : i32, i32, i32
  }
  func.func @transform_1(%arg0: i32) -> (i32, i32) {
    %c0_i32 = arith.constant 0 : i32
    %c0_i32_0 = arith.constant 0 : i32
    %c0_i32_1 = arith.constant 0 : i32
    return %c0_i32, %c0_i32_0 : i32, i32
  }
  func.func @transform_2(%arg0: i32) -> (i32, i32) {
    %c0_i32 = arith.constant 0 : i32
    %c0_i32_0 = arith.constant 0 : i32
    %c0_i32_1 = arith.constant 0 : i32
    return %c0_i32, %c0_i32_0 : i32, i32
  }
  func.func @transform_3(%arg0: i32) -> (i32, i32) {
    %c0_i32 = arith.constant 0 : i32
    %c0_i32_0 = arith.constant 0 : i32
    return %arg0, %c0_i32 : i32, i32
  }
  func.func @transform_4(%arg0: i32) -> (i32, i32) {
    %c0_i32 = arith.constant 0 : i32
    %c0_i32_0 = arith.constant 0 : i32
    return %arg0, %c0_i32 : i32, i32
  }
  func.func @transform_5(%arg0: i32) -> (i32, i32) {
    %c0_i32 = arith.constant 0 : i32
    %c0_i32_0 = arith.constant 0 : i32
    return %arg0, %c0_i32 : i32, i32
  }
  func.func @transform_6(%arg0: i32) -> (i32, i32) {
    %c0_i32 = arith.constant 0 : i32
    %c0_i32_0 = arith.constant 0 : i32
    return %arg0, %c0_i32 : i32, i32
  }
}

</mosaic_0001>

<bundles_post_ra>
// kernel: tpu_custom_call.1
= control target key start
LH: loop header
LB: loop body
LE: loop exit
PB: predicated region body
PF: predicated region fallthrough
CT: control target
= control target key end

     0   :  { %12 = vsyncpa [#allocation3], 0  ;;  %s1377_s0 = inlined_call_operand.hbm [shape: f32[8,16,144], index: 0, kind: input, shape index: {}]   ;;  %s1378_s1 = inlined_call_operand.vmem [shape: f32[144,16], index: 1, kind: input, shape index: {}]   ;;  %s1379_s2 = inlined_call_operand.vmem [shape: f32[1,16], index: 2, kind: input, shape index: {}]   ;;  %s1380_s3 = inlined_call_operand.hbm [shape: f32[8,16], index: 3, kind: output, shape index: {0}]   ;;  %s1381_s4 = inlined_call_operand.hbm [shape: f32[8,16], index: 4, kind: output, shape index: {1}]   ;;  %s1382_s5 = inlined_call_operand.hbm [shape: f32[8,16], index: 5, kind: output, shape index: {2}]   ;;  %s1383_s6 = inlined_call_operand.hbm [shape: f32[8,16], index: 6, kind: output, shape index: {3}]  }
   0x1   :  { %13 = vsyncpa [#allocation4], 0 }
   0x2   :  { %14 = vsyncpa [#allocation7], 0 }
   0x3   :  { %15 = vsyncpa [#allocation10], 0  ;;  %s909_s21 = smov [#allocation2]   ;;  %s791_s25 = scalar_lea.hbm %s1377_s0, 4096 }
   0x4   :  { %s21_s22 = sshll.u32 %s909_s21, 4  ;;  %p792_p0 = scmp.ne.s32.totalorder %s1377_s0, %s791_s25  ;;  %s22_s22 = int_to_ptr.vmem [resolvable:$true] %s21_s22 }
   0x5   :  { %p795_p1 = scmp.lt.u32.totalorder %s791_s25, %s1377_s0 }
   0x7   :  { %p797_p2 = pnand %p795_p1, %p792_p0 }
   0x9   :  { %800 = shalt.err (!%p797_p2)
}
   0xa   :  { %s801_s30 = scalar_lea.vmem %s22_s22, 4096  ;;  %p806_p4 = scmp.lt.s32.totalorder %s22_s22, %s22_s22 }
   0xb   :  { %p802_p3 = scmp.ne.s32.totalorder %s22_s22, %s801_s30  ;;  %p807_p5 = scmp.lt.s32.totalorder %s801_s30, %s801_s30 }
   0xd   :  { %p808_p6 = por %p807_p5, %p806_p4 }
   0xf   :  { %p809_p7 = pnand %p808_p6, %p802_p3 }
  0x11   :  { %812 = shalt.err (!%p809_p7)
}
  0x12   :  { %s910_s7 = smov 256   ;;  %s911_s8 = smov 16  }
  0x13   :  { %27 = dma.hbm_to_vmem [thread:$0]  %s1377_s0, 4096, %s22_s22, [#allocation3], %s910_s7, %s910_s7, %s911_s8  }
  0x14   :  { %901 = dma.done.wait [#allocation3], 4096  }
  0x15   :  { %902 = vsyncadd [#allocation3], 4294963200  ;;  %v912_v0 = vmov 0.0|0.0   ;;  %v67_v1 = vld [vmem:[%s1378_s1] sm:$0xff]  ;;  %v68_v2 = vld [vmem:[%s1378_s1 + $0x8] sm:$0xff]  ;;  %vm92_vm0 = vcmask 130048  }
  0x16   :  { %738 = vmatprep.subr.bf16.mxu0 %v912_v0  ;;  %765 = vmatprep.subr.bf16.mxu1 %v912_v0  ;;  %v69_v3 = vld [vmem:[%s1378_s1 + $0x10] sm:$0xff]  ;;  %v739_v4 = vpack.c.bf16 %v68_v2, %v67_v1  ;;  %v70_v5 = vld [vmem:[%s1378_s1 + $0x18] sm:$0xff]  ;;  %v71_v7 = vld [vmem:[%s1378_s1 + $0x20] sm:$0xff]  ;;  %vm366_vm1 = vcmask 1041409   ;;  %vm368_vm2 = vcmask 1042434   ;;  %vm370_vm3 = vcmask 1043459  }
  0x17   :  { %v742_v6 = vpack.c.bf16 %v70_v5, %v69_v3  ;;  %v72_v8 = vld [vmem:[%s1378_s1 + $0x28] sm:$0xff]  ;;  %v73_v12 = vld [vmem:[%s1378_s1 + $0x30] sm:$0xff]  ;;  %v74_v13 = vld [vmem:[%s1378_s1 + $0x38] sm:$0xff]  ;;  %vm372_vm4 = vcmask 1044484   ;;  %vm374_vm5 = vcmask 1045509   ;;  %vm376_vm6 = vcmask 1046534  }
  0x18   :  { %740 = vmatpush1.bf16.msra.mxu0 %v739_v4  ;;  %774 = vmatpush1.bf16.msra.mxu1 %v739_v4  ;;  %v36_v9 = vld [vmem:[#allocation2 + $0x8] sm:$0xff]  ;;  %v745_v11 = vpack.c.bf16 %v72_v8, %v71_v7  ;;  %v748_v14 = vpack.c.bf16 %v74_v13, %v73_v12  ;;  %v75_v15 = vld [vmem:[%s1378_s1 + $0x40] sm:$0xff]  ;;  %v77_v18 = vld [vmem:[%s1378_s1 + $0x50] sm:$0xff]  ;;  %vm378_vm7 = vcmask 1047559   ;;  %s914_s23 = smov [#allocation5]   ;;  %s915_s25 = smov [#allocation8]  }
  0x19   :  { %741 = vmatprep.subr.bf16.mxu0 %v912_v0  ;;  %766 = vmatprep.subr.bf16.mxu1 %v912_v0  ;;  %v52_v10 = vld [vmem:[#allocation2 + $0x88] sm:$0xff]  ;;  %v78_v19 = vld [vmem:[%s1378_s1 + $0x58] sm:$0xff]  ;;  %v79_v21 = vld [vmem:[%s1378_s1 + $0x60] sm:$0xff]  ;;  %s671_s24 = sshll.u32 %s914_s23, 4  ;;  %s691_s26 = sshll.u32 %s915_s25, 4  ;;  %s1282_s24 = int_to_ptr.vmem [resolvable:$true] %s671_s24  ;;  %s1290_s26 = int_to_ptr.vmem [resolvable:$true] %s691_s26 }
  0x1a   :  { %722 = vmatprep.mubr.msk.f32.mxu0 %vm92_vm0, %v36_v9  ;;  %730 = vmatprep.mubr.msk.f32.mxu1 %vm92_vm0, %v52_v10  ;;  %v76_v16 = vld [vmem:[%s1378_s1 + $0x48] sm:$0xff]  ;;  %v754_v20 = vpack.c.bf16 %v78_v19, %v77_v18  ;;  %v81_v24 = vld [vmem:[%s1378_s1 + $0x70] sm:$0xff]  ;;  %v82_v25 = vld [vmem:[%s1378_s1 + $0x78] sm:$0xff] }
  0x1b   :  { %v751_v17 = vpack.c.bf16 %v76_v16, %v75_v15  ;;  %v80_v22 = vld [vmem:[%s1378_s1 + $0x68] sm:$0xff]  ;;  %v760_v26 = vpack.c.bf16 %v82_v25, %v81_v24  ;;  %v83_v27 = vld [vmem:[%s1378_s1 + $0x80] sm:$0xff]  ;;  %v38_v32 = vld [vmem:[#allocation2 + $0x18] sm:$0xff] }
  0x1c   :  { %743 = vmatpush1.bf16.msra.mxu0 %v742_v6  ;;  %775 = vmatpush1.bf16.msra.mxu1 %v742_v6  ;;  %v757_v23 = vpack.c.bf16 %v80_v22, %v79_v21  ;;  %v84_v28 = vld [vmem:[%s1378_s1 + $0x88] sm:$0xff]  ;;  %v35_v30 = vld [vmem:[#allocation2] sm:$0xff]  ;;  %v54_v33 = vld [vmem:[#allocation2 + $0x98] sm:$0xff] }
  0x1d   :  { %744 = vmatprep.subr.bf16.mxu0 %v912_v0  ;;  %767 = vmatprep.subr.bf16.mxu1 %v912_v0  ;;  %v763_v29 = vpack.c.bf16 %v84_v28, %v83_v27  ;;  %v51_v31 = vld [vmem:[#allocation2 + $0x80] sm:$0xff]  ;;  %v37_v34 = vld [vmem:[#allocation2 + $0x10] sm:$0xff]  ;;  %v40_v36 = vld [vmem:[#allocation2 + $0x28] sm:$0xff] }
  0x1e   :  { %v53_v35 = vld [vmem:[#allocation2 + $0x90] sm:$0xff]  ;;  %v56_v37 = vld [vmem:[#allocation2 + $0xa8] sm:$0xff]  ;;  %v39_v38 = vld [vmem:[#allocation2 + $0x20] sm:$0xff] }
  0x1f   :  { %v55_v39 = vld [vmem:[#allocation2 + $0xa0] sm:$0xff]  ;;  %v42_v40 = vld [vmem:[#allocation2 + $0x38] sm:$0xff]  ;;  %v41_v42 = vld [vmem:[#allocation2 + $0x30] sm:$0xff] }
  0x20   :  { %746 = vmatpush1.bf16.msra.mxu0 %v745_v11  ;;  %776 = vmatpush1.bf16.msra.mxu1 %v745_v11  ;;  %v58_v41 = vld [vmem:[#allocation2 + $0xb8] sm:$0xff]  ;;  %v57_v43 = vld [vmem:[#allocation2 + $0xb0] sm:$0xff]  ;;  %v44_v44 = vld [vmem:[#allocation2 + $0x48] sm:$0xff] }
  0x21   :  { %747 = vmatprep.subr.bf16.mxu0 %v912_v0  ;;  %768 = vmatprep.subr.bf16.mxu1 %v912_v0  ;;  %v60_v45 = vld [vmem:[#allocation2 + $0xc8] sm:$0xff]  ;;  %v43_v46 = vld [vmem:[#allocation2 + $0x40] sm:$0xff]  ;;  %v46_v48 = vld [vmem:[#allocation2 + $0x58] sm:$0xff] }
  0x22   :  { %v59_v47 = vld [vmem:[#allocation2 + $0xc0] sm:$0xff]  ;;  %v62_v49 = vld [vmem:[#allocation2 + $0xd8] sm:$0xff]  ;;  %v45_v50 = vld [vmem:[#allocation2 + $0x50] sm:$0xff] }
  0x23   :  { %v61_v51 = vld [vmem:[#allocation2 + $0xd0] sm:$0xff]  ;;  %v48_v52 = vld [vmem:[#allocation2 + $0x68] sm:$0xff]  ;;  %v47_v54 = vld [vmem:[#allocation2 + $0x60] sm:$0xff] }
  0x24   :  { %749 = vmatpush1.bf16.msra.mxu0 %v748_v14  ;;  %777 = vmatpush1.bf16.msra.mxu1 %v748_v14  ;;  %v64_v53 = vld [vmem:[#allocation2 + $0xe8] sm:$0xff]  ;;  %v63_v55 = vld [vmem:[#allocation2 + $0xe0] sm:$0xff]  ;;  %v50_v56 = vld [vmem:[#allocation2 + $0x78] sm:$0xff] }
  0x25   :  { %750 = vmatprep.subr.bf16.mxu0 %v912_v0  ;;  %769 = vmatprep.subr.bf16.mxu1 %v912_v0  ;;  %v66_v57 = vld [vmem:[#allocation2 + $0xf8] sm:$0xff]  ;;  %v49_v58 = vld [vmem:[#allocation2 + $0x70] sm:$0xff]  ;;  %v1055_v60 = vld [vmem:[%s1379_s2] ss:$0 sm:$0xff]  ;;  %s913_s2 = smov [#allocation6]  }
  0x26   :  { %v65_v59 = vld [vmem:[#allocation2 + $0xf0] sm:$0xff]  ;;  %s681_s22 = sshll.u32 %s913_s2, 4  ;;  %s682_s22 = int_to_ptr.vmem [resolvable:$true] %s681_s22 }
  0x27   :  { %s813_s27 = scalar_lea.vmem %s682_s22, 128  ;;  %p818_p9 = scmp.lt.s32.totalorder %s682_s22, %s682_s22 }
  0x28   :  { %752 = vmatpush1.bf16.msra.mxu0 %v751_v17  ;;  %778 = vmatpush1.bf16.msra.mxu1 %v751_v17  ;;  %p814_p8 = scmp.ne.s32.totalorder %s682_s22, %s813_s27  ;;  %p819_p10 = scmp.lt.s32.totalorder %s813_s27, %s813_s27 }
  0x29   :  { %753 = vmatprep.subr.bf16.mxu0 %v912_v0  ;;  %770 = vmatprep.subr.bf16.mxu1 %v912_v0 }
  0x2a   :  { %p820_p11 = por %p819_p10, %p818_p9 }
  0x2c   :  { %755 = vmatpush1.bf16.msra.mxu0 %v754_v20  ;;  %779 = vmatpush1.bf16.msra.mxu1 %v754_v20  ;;  %p821_p12 = pnand %p820_p11, %p814_p8 }
  0x2d   :  { %756 = vmatprep.subr.bf16.mxu0 %v912_v0  ;;  %771 = vmatprep.subr.bf16.mxu1 %v912_v0 }
  0x30   :  { %758 = vmatpush1.bf16.msra.mxu0 %v757_v23  ;;  %780 = vmatpush1.bf16.msra.mxu1 %v757_v23 }
  0x31   :  { %759 = vmatprep.subr.bf16.mxu0 %v912_v0  ;;  %772 = vmatprep.subr.bf16.mxu1 %v912_v0 }
  0x34   :  { %761 = vmatpush1.bf16.msra.mxu0 %v760_v26  ;;  %781 = vmatpush1.bf16.msra.mxu1 %v760_v26 }
  0x35   :  { %762 = vmatprep.subr.bf16.mxu0 %v912_v0  ;;  %773 = vmatprep.subr.bf16.mxu1 %v912_v0 }
  0x38   :  { %764 = vmatpush1.bf16.msra.mxu0 %v763_v29  ;;  %782 = vmatpush1.bf16.msra.mxu1 %v763_v29 }
  0x3b   :  { %206 = vmatmul.mubr.f32.vlgmr.msra.gmra.mrb[0].mxu0 %v35_v30  ;;  %246 = vmatmul.mubr.f32.vlgmr.msra.gmra.mrb[0].mxu1 %v51_v31 }
  0x3c   :  { %723 = vmatprep.mubr.msk.f32.mxu0 %vm92_vm0, %v38_v32  ;;  %731 = vmatprep.mubr.msk.f32.mxu1 %vm92_vm0, %v54_v33 }
  0x3f   :  { %211 = vmatmul.mubr.f32.gmra.mrb[2].mxu0 %v37_v34  ;;  %251 = vmatmul.mubr.f32.gmra.mrb[2].mxu1 %v53_v35 }
  0x40   :  { %724 = vmatprep.mubr.msk.f32.mxu0 %vm92_vm0, %v40_v36  ;;  %732 = vmatprep.mubr.msk.f32.mxu1 %vm92_vm0, %v56_v37 }
  0x43   :  { %216 = vmatmul.mubr.f32.gmra.mrb[4].mxu0 %v39_v38  ;;  %256 = vmatmul.mubr.f32.gmra.mrb[4].mxu1 %v55_v39 }
  0x44   :  { %725 = vmatprep.mubr.msk.f32.mxu0 %vm92_vm0, %v42_v40  ;;  %733 = vmatprep.mubr.msk.f32.mxu1 %vm92_vm0, %v58_v41 }
  0x47   :  { %221 = vmatmul.mubr.f32.gmra.mrb[6].mxu0 %v41_v42  ;;  %261 = vmatmul.mubr.f32.gmra.mrb[6].mxu1 %v57_v43 }
  0x48   :  { %726 = vmatprep.mubr.msk.f32.mxu0 %vm92_vm0, %v44_v44  ;;  %734 = vmatprep.mubr.msk.f32.mxu1 %vm92_vm0, %v60_v45 }
  0x4b   :  { %226 = vmatmul.mubr.f32.gmra.mrb[8].mxu0 %v43_v46  ;;  %266 = vmatmul.mubr.f32.gmra.mrb[8].mxu1 %v59_v47 }
  0x4c   :  { %727 = vmatprep.mubr.msk.f32.mxu0 %vm92_vm0, %v46_v48  ;;  %735 = vmatprep.mubr.msk.f32.mxu1 %vm92_vm0, %v62_v49 }
  0x4f   :  { %231 = vmatmul.mubr.f32.gmra.mrb[10].mxu0 %v45_v50  ;;  %271 = vmatmul.mubr.f32.gmra.mrb[10].mxu1 %v61_v51 }
  0x50   :  { %728 = vmatprep.mubr.msk.f32.mxu0 %vm92_vm0, %v48_v52  ;;  %736 = vmatprep.mubr.msk.f32.mxu1 %vm92_vm0, %v64_v53 }
  0x53   :  { %236 = vmatmul.mubr.f32.gmra.mrb[12].mxu0 %v47_v54  ;;  %276 = vmatmul.mubr.f32.gmra.mrb[12].mxu1 %v63_v55 }
  0x54   :  { %729 = vmatprep.mubr.msk.f32.mxu0 %vm92_vm0, %v50_v56  ;;  %737 = vmatprep.mubr.msk.f32.mxu1 %vm92_vm0, %v66_v57 }
  0x57   :  { %241 = vmatmul.mubr.f32.gmra.mrb[14].mxu0 %v49_v58  ;;  %281 = vmatmul.mubr.f32.gmra.mrb[14].mxu1 %v65_v59 }
 0x10e   :  { %v207_v61 = vpop.f32.mrb[0].mxu0  ;;  %v247_v62 = vpop.f32.mrb[0].mxu1 }
 0x10f   :  { %v208_v63 = vadd.f32 %v1055_v60, %v207_v61  ;;  %v209_v0 = vpop.f32.mrb[1].mxu0  ;;  %v248_v1 = vadd.f32 %v1055_v60, %v247_v62  ;;  %v249_v2 = vpop.f32.mrb[1].mxu1 }
 0x111   :  { %v382_v3 = vmul.f32 %v208_v63, %v208_v63  ;;  %v286_v4 = vsel %vm92_vm0, %v208_v63, 0.0  ;;  %v487_v5 = vsel %vm92_vm0, %v208_v63, -inf  ;;  %v390_v6 = vmul.f32 %v248_v1, %v248_v1 }
 0x112   :  { %v212_v7 = vpop.f32.mrb[2].mxu0  ;;  %v252_v8 = vpop.f32.mrb[2].mxu1  ;;  %v576_v9 = vsel %vm92_vm0, %v208_v63, inf  ;;  %v322_v10 = vsel %vm92_vm0, %v248_v1, 0.0  ;;  %v523_v17 = vsel %vm92_vm0, %v248_v1, -inf  ;;  %v612_v18 = vsel %vm92_vm0, %v248_v1, inf }
 0x113   :  { %v213_v11 = vadd.f32 %v1055_v60, %v212_v7  ;;  %v253_v12 = vadd.f32 %v1055_v60, %v252_v8  ;;  %v214_v13 = vpop.f32.mrb[3].mxu0  ;;  %v254_v14 = vpop.f32.mrb[3].mxu1  ;;  %v398_v15 = vsel %vm92_vm0, %v382_v3, 0.0  ;;  %v434_v16 = vsel %vm92_vm0, %v390_v6, 0.0 }
 0x115   :  { %v287_v19 = vsel %vm92_vm0, %v213_v11, 0.0  ;;  %v383_v20 = vmul.f32 %v213_v11, %v213_v11  ;;  %v488_v21 = vsel %vm92_vm0, %v213_v11, -inf  ;;  %v577_v22 = vsel %vm92_vm0, %v213_v11, inf }
 0x116   :  { %v288_v23 = vadd.f32 %v287_v19, %v286_v4  ;;  %v489_v24 = vmax.f32 %v487_v5, %v488_v21  ;;  %v578_v25 = vmin.f32 %v576_v9, %v577_v22  ;;  %v323_v26 = vsel %vm92_vm0, %v253_v12, 0.0  ;;  %v1073_v27 = vpop.f32.mrb[4].mxu0  ;;  %v1075_v28 = vpop.f32.mrb[4].mxu1 }
 0x117   :  { %v399_v29 = vsel %vm92_vm0, %v383_v20, 0.0  ;;  %v324_v30 = vadd.f32 %v323_v26, %v322_v10  ;;  %v391_v31 = vmul.f32 %v253_v12, %v253_v12  ;;  %v524_v32 = vsel %vm92_vm0, %v253_v12, -inf  ;;  %v219_v33 = vpop.f32.mrb[5].mxu0  ;;  %v259_v34 = vpop.f32.mrb[5].mxu1 }
 0x118   :  { %v289_v35 = vrot.slane %v288_v23, 4  ;;  %v400_v36 = vadd.f32 %v399_v29, %v398_v15  ;;  %v490_v37 = vrot.slane %v489_v24, 4  ;;  %v579_v38 = vrot.slane %v578_v25, 4 }
 0x119   :  { %v325_v39 = vrot.slane %v324_v30, 4  ;;  %v435_v40 = vsel %vm92_vm0, %v391_v31, 0.0  ;;  %v525_v41 = vmax.f32 %v523_v17, %v524_v32  ;;  %v613_v42 = vsel %vm92_vm0, %v253_v12, inf }
 0x11a   :  { %v290_v43 = vadd.f32 %v289_v35, %v288_v23  ;;  %v401_v44 = vrot.slane %v400_v36, 4  ;;  %v491_v45 = vmax.f32 %v489_v24, %v490_v37  ;;  %v580_v46 = vmin.f32 %v578_v25, %v579_v38  ;;  %v222_v47 = vpop.f32.mrb[6].mxu0  ;;  %v262_v48 = vpop.f32.mrb[6].mxu1 }
 0x11b   :  { %v326_v49 = vadd.f32 %v325_v39, %v324_v30  ;;  %v436_v50 = vadd.f32 %v435_v40, %v434_v16  ;;  %v526_v51 = vrot.slane %v525_v41, 4  ;;  %v614_v52 = vmin.f32 %v612_v18, %v613_v42  ;;  %v224_v53 = vpop.f32.mrb[7].mxu0  ;;  %v264_v54 = vpop.f32.mrb[7].mxu1 }
 0x11c   :  { %v291_v55 = vrot.slane %v290_v43, 2  ;;  %v402_v56 = vadd.f32 %v401_v44, %v400_v36  ;;  %v492_v57 = vrot.slane %v491_v45, 2  ;;  %v581_v58 = vrot.slane %v580_v46, 2 }
 0x11d   :  { %v327_v59 = vrot.slane %v326_v49, 2  ;;  %v437_v61 = vrot.slane %v436_v50, 4  ;;  %v527_v62 = vmax.f32 %v525_v41, %v526_v51  ;;  %v615_v63 = vrot.slane %v614_v52, 4 }
 0x11e   :  { %v292_v0 = vadd.f32 %v291_v55, %v290_v43  ;;  %v403_v1 = vrot.slane %v402_v56, 2  ;;  %v493_v2 = vmax.f32 %v491_v45, %v492_v57  ;;  %v582_v3 = vmin.f32 %v580_v46, %v581_v58  ;;  %v1081_v4 = vpop.f32.mrb[8].mxu0  ;;  %v1083_v5 = vpop.f32.mrb[8].mxu1 }
 0x11f   :  { %v1085_v6 = vadd.f32 %v327_v59, %v326_v49  ;;  %v438_v7 = vadd.f32 %v437_v61, %v436_v50  ;;  %v528_v8 = vrot.slane %v527_v62, 2  ;;  %v616_v9 = vmin.f32 %v614_v52, %v615_v63  ;;  %v229_v10 = vpop.f32.mrb[9].mxu0  ;;  %v269_v11 = vpop.f32.mrb[9].mxu1 }
 0x120   :  { %v293_v12 = vrot.slane %v292_v0, 1  ;;  %v404_v13 = vadd.f32 %v403_v1, %v402_v56  ;;  %v494_v14 = vrot.slane %v493_v2, 1  ;;  %v583_v15 = vrot.slane %v582_v3, 1 }
 0x121   :  { %v439_v16 = vrot.slane %v438_v7, 2  ;;  %v529_v17 = vmax.f32 %v527_v62, %v528_v8  ;;  %v617_v18 = vrot.slane %v616_v9, 2  ;;  %v329_v22 = vrot.slane %v1085_v6, 1 }
 0x122   :  { %v1087_v19 = vadd.f32 %v293_v12, %v292_v0  ;;  %v405_v20 = vrot.slane %v404_v13, 1  ;;  %v1089_v21 = vmax.f32 %v493_v2, %v494_v14  ;;  %v1092_v23 = vpop.f32.mrb[10].mxu0  ;;  %v1094_v24 = vpop.f32.mrb[10].mxu1  ;;  %v1096_v25 = vmin.f32 %v582_v3, %v583_v15 }
 0x123   :  { %v1098_v26 = vadd.f32 %v439_v16, %v438_v7  ;;  %v530_v29 = vrot.slane %v529_v17, 1  ;;  %v218_v30 = vadd.f32 %v1055_v60, %v1073_v27  ;;  %v234_v31 = vpop.f32.mrb[11].mxu0  ;;  %v274_v32 = vpop.f32.mrb[11].mxu1  ;;  %v1104_v34 = vmin.f32 %v616_v9, %v617_v18 }
 0x124   :  { %v1102_v33 = vadd.f32 %v405_v20, %v404_v13  ;;  %v258_v35 = vadd.f32 %v1055_v60, %v1075_v28  ;;  %v223_v36 = vadd.f32 %v1055_v60, %v222_v47  ;;  %v263_v40 = vadd.f32 %v1055_v60, %v262_v48 }
 0x125   :  { %v1109_v37 = vmax.f32 %v529_v17, %v530_v29  ;;  %v295_v38 = vsel %vm92_vm0, %v218_v30, 0.0  ;;  %v384_v39 = vmul.f32 %v218_v30, %v218_v30  ;;  %v496_v27 = vsel %vm92_vm0, %v218_v30, -inf }
 0x126   :  { %v585_v41 = vsel %vm92_vm0, %v218_v30, inf  ;;  %v331_v42 = vsel %vm92_vm0, %v258_v35, 0.0  ;;  %v392_v43 = vmul.f32 %v258_v35, %v258_v35  ;;  %v1116_v44 = vpop.f32.mrb[12].mxu0  ;;  %v1118_v45 = vpop.f32.mrb[12].mxu1  ;;  %v532_v46 = vsel %vm92_vm0, %v258_v35, -inf }
 0x127   :  { %v407_v28 = vsel %vm92_vm0, %v384_v39, 0.0  ;;  %v621_v47 = vsel %vm92_vm0, %v258_v35, inf  ;;  %v296_v49 = vsel %vm92_vm0, %v223_v36, 0.0  ;;  %v239_v48 = vpop.f32.mrb[13].mxu0  ;;  %v279_v50 = vpop.f32.mrb[13].mxu1  ;;  %v385_v53 = vmul.f32 %v223_v36, %v223_v36 }
 0x128   :  { %v443_v51 = vsel %vm92_vm0, %v392_v43, 0.0  ;;  %v297_v52 = vadd.f32 %v296_v49, %v295_v38  ;;  %v497_v54 = vsel %vm92_vm0, %v223_v36, -inf  ;;  %v586_v56 = vsel %vm92_vm0, %v223_v36, inf }
 0x129   :  { %v498_v55 = vmax.f32 %v496_v27, %v497_v54  ;;  %v332_v57 = vsel %vm92_vm0, %v263_v40, 0.0  ;;  %v393_v58 = vmul.f32 %v263_v40, %v263_v40  ;;  %v408_v61 = vsel %vm92_vm0, %v385_v53, 0.0 }
 0x12a   :  { %v298_v59 = vrot.slane %v297_v52, 4  ;;  %v587_v62 = vmin.f32 %v585_v41, %v586_v56  ;;  %v333_v63 = vadd.f32 %v332_v57, %v331_v42  ;;  %v1129_v0 = vpop.f32.mrb[14].mxu0  ;;  %v1131_v1 = vpop.f32.mrb[14].mxu1  ;;  %v409_v2 = vadd.f32 %v408_v61, %v407_v28 }
 0x12b   :  { %v499_v3 = vrot.slane %v498_v55, 4  ;;  %v444_v7 = vsel %vm92_vm0, %v393_v58, 0.0  ;;  %v533_v8 = vsel %vm92_vm0, %v263_v40, -inf  ;;  %v244_v9 = vpop.f32.mrb[15].mxu0  ;;  %v284_v10 = vpop.f32.mrb[15].mxu1  ;;  %v622_v18 = vsel %vm92_vm0, %v263_v40, inf }
 0x12c   :  { %v299_v11 = vadd.f32 %v298_v59, %v297_v52  ;;  %v588_v12 = vrot.slane %v587_v62, 4  ;;  %v334_v13 = vrot.slane %v333_v63, 4  ;;  %v445_v14 = vadd.f32 %v444_v7, %v443_v51 }
 0x12d   :  { %v410_v15 = vrot.slane %v409_v2, 4  ;;  %v500_v16 = vmax.f32 %v498_v55, %v499_v3  ;;  %v534_v17 = vmax.f32 %v532_v46, %v533_v8  ;;  %v623_v38 = vmin.f32 %v621_v47, %v622_v18 }
 0x12e   :  { %v300_v20 = vrot.slane %v299_v11, 2  ;;  %v589_v29 = vmin.f32 %v587_v62, %v588_v12  ;;  %v335_v30 = vadd.f32 %v334_v13, %v333_v63  ;;  %v446_v31 = vrot.slane %v445_v14, 4 }
 0x12f   :  { %v411_v32 = vadd.f32 %v410_v15, %v409_v2  ;;  %v501_v35 = vrot.slane %v500_v16, 2  ;;  %v535_v36 = vrot.slane %v534_v17, 4  ;;  %v624_v48 = vrot.slane %v623_v38, 4 }
 0x130   :  { %v301_v39 = vadd.f32 %v300_v20, %v299_v11  ;;  %v590_v27 = vrot.slane %v589_v29, 2  ;;  %v336_v41 = vrot.slane %v335_v30, 2  ;;  %v1136_v42 = vadd.f32 %v446_v31, %v445_v14 }
 0x131   :  { %v412_v43 = vrot.slane %v411_v32, 2  ;;  %v502_v28 = vmax.f32 %v500_v16, %v501_v35  ;;  %v536_v49 = vmax.f32 %v534_v17, %v535_v36  ;;  %v619_v46 = vrot.slane %v1104_v34, 1 }
 0x132   :  { %v302_v40 = vrot.slane %v301_v39, 1  ;;  %v591_v50 = vmin.f32 %v589_v29, %v590_v27  ;;  %v1139_v51 = vadd.f32 %v336_v41, %v335_v30  ;;  %v625_v55 = vmin.f32 %v623_v38, %v624_v48 }
 0x133   :  { %v413_v52 = vadd.f32 %v412_v43, %v411_v32  ;;  %v503_v53 = vrot.slane %v502_v28, 1  ;;  %v537_v54 = vrot.slane %v536_v49, 2  ;;  %v448_v56 = vrot.slane %v1136_v42, 2 }
 0x134   :  { %v592_v47 = vrot.slane %v591_v50, 1  ;;  %v228_v57 = vadd.f32 %v1055_v60, %v1081_v4  ;;  %v268_v58 = vadd.f32 %v1055_v60, %v1083_v5  ;;  %v1146_v59 = vadd.f32 %v302_v40, %v301_v39 }
 0x135   :  { %v414_v61 = vrot.slane %v413_v52, 1  ;;  %v1148_v62 = vmax.f32 %v536_v49, %v537_v54  ;;  %v626_v63 = vrot.slane %v625_v55, 2  ;;  %v1150_v2 = vmax.f32 %v502_v28, %v503_v53 }
 0x136   :  { %v1152_v3 = vmin.f32 %v591_v50, %v592_v47  ;;  %v304_v7 = vsel %vm92_vm0, %v228_v57, 0.0  ;;  %v386_v8 = vmul.f32 %v228_v57, %v228_v57  ;;  %v505_v5 = vsel %vm92_vm0, %v228_v57, -inf }
 0x137   :  { %v1155_v9 = vadd.f32 %v414_v61, %v413_v52  ;;  %v539_v4 = vrot.slane %v1148_v62, 1  ;;  %v1158_v10 = vmin.f32 %v625_v55, %v626_v63  ;;  %v594_v12 = vsel %vm92_vm0, %v228_v57, inf }
 0x138   :  { %v416_v11 = vsel %vm92_vm0, %v386_v8, 0.0  ;;  %v340_v13 = vsel %vm92_vm0, %v268_v58, 0.0  ;;  %v394_v14 = vmul.f32 %v268_v58, %v268_v58  ;;  %v541_v15 = vsel %vm92_vm0, %v268_v58, -inf }
 0x139   :  { %v630_v16 = vsel %vm92_vm0, %v268_v58, inf  ;;  %v233_v17 = vadd.f32 %v1055_v60, %v1092_v23  ;;  %v273_v18 = vadd.f32 %v1055_v60, %v1094_v24  ;;  %v238_v29 = vadd.f32 %v1055_v60, %v1116_v44 }
 0x13a   :  { %v452_v20 = vsel %vm92_vm0, %v394_v14, 0.0  ;;  %v1175_v30 = vadd.f32 %v1055_v60, %v1118_v45  ;;  %v1179_v31 = vadd.f32 %v1055_v60, %v1129_v0 }
 0x13b   :  { %v305_v32 = vsel %vm92_vm0, %v233_v17, 0.0  ;;  %v387_v35 = vmul.f32 %v233_v17, %v233_v17  ;;  %v506_v23 = vsel %vm92_vm0, %v233_v17, -inf  ;;  %v595_v24 = vsel %vm92_vm0, %v233_v17, inf }
 0x13c   :  { %v306_v36 = vadd.f32 %v305_v32, %v304_v7  ;;  %v507_v38 = vmax.f32 %v505_v5, %v506_v23  ;;  %v596_v39 = vmin.f32 %v594_v12, %v595_v24  ;;  %v341_v44 = vsel %vm92_vm0, %v273_v18, 0.0 }
 0x13d   :  { %v417_v27 = vsel %vm92_vm0, %v387_v35, 0.0  ;;  %v342_v45 = vadd.f32 %v341_v44, %v340_v13  ;;  %v395_v41 = vmul.f32 %v273_v18, %v273_v18  ;;  %v542_v43 = vsel %vm92_vm0, %v273_v18, -inf }
 0x13e   :  { %v307_v0 = vrot.slane %v306_v36, 4  ;;  %v418_v28 = vadd.f32 %v417_v27, %v416_v11  ;;  %v508_v49 = vrot.slane %v507_v38, 4  ;;  %v597_v48 = vrot.slane %v596_v39, 4 }
 0x13f   :  { %v343_v40 = vrot.slane %v342_v45, 4  ;;  %v453_v50 = vsel %vm92_vm0, %v395_v41, 0.0  ;;  %v543_v52 = vmax.f32 %v541_v15, %v542_v43  ;;  %v631_v53 = vsel %vm92_vm0, %v273_v18, inf }
 0x140   :  { %v308_v54 = vadd.f32 %v307_v0, %v306_v36  ;;  %v419_v55 = vrot.slane %v418_v28, 4  ;;  %v509_v47 = vmax.f32 %v507_v38, %v508_v49  ;;  %v598_v57 = vmin.f32 %v596_v39, %v597_v48 }
 0x141   :  { %v1189_v58 = vadd.f32 %v343_v40, %v342_v45  ;;  %v454_v61 = vadd.f32 %v453_v50, %v452_v20  ;;  %v544_v63 = vrot.slane %v543_v52, 4  ;;  %v632_v7 = vmin.f32 %v630_v16, %v631_v53 }
 0x142   :  { %v309_v8 = vrot.slane %v308_v54, 2  ;;  %v420_v5 = vadd.f32 %v419_v55, %v418_v28  ;;  %v510_v11 = vrot.slane %v509_v47, 2  ;;  %v599_v12 = vrot.slane %v598_v57, 2 }
 0x143   :  { %v455_v13 = vrot.slane %v454_v61, 4  ;;  %v545_v14 = vmax.f32 %v543_v52, %v544_v63  ;;  %v633_v17 = vrot.slane %v632_v7, 4  ;;  %v283_v15 = vadd.f32 %v1055_v60, %v1131_v1 }
 0x144   :  { %v310_v18 = vadd.f32 %v309_v8, %v308_v54  ;;  %v421_v32 = vrot.slane %v420_v5, 2  ;;  %v511_v35 = vmax.f32 %v509_v47, %v510_v11  ;;  %v600_v23 = vmin.f32 %v598_v57, %v599_v12 }
 0x145   :  { %v345_v24 = vrot.slane %v1189_v58, 2  ;;  %v1194_v36 = vadd.f32 %v455_v13, %v454_v61  ;;  %v546_v20 = vrot.slane %v545_v14, 2  ;;  %v1196_v16 = vmin.f32 %v632_v7, %v633_v17 }
 0x146   :  { %v311_v38 = vrot.slane %v310_v18, 1  ;;  %v422_v39 = vadd.f32 %v421_v32, %v420_v5  ;;  %v512_v44 = vrot.slane %v511_v35, 1  ;;  %v601_v27 = vrot.slane %v600_v23, 1 }
 0x147   :  { %v1198_v45 = vmax.f32 %v545_v14, %v546_v20  ;;  %v635_v41 = vrot.slane %v1196_v16, 2  ;;  %v313_v60 = vsel %vm92_vm0, %v238_v29, 0.0  ;;  %v388_v1 = vmul.f32 %v238_v29, %v238_v29 }
 0x148   :  { %v1202_v43 = vadd.f32 %v311_v38, %v310_v18  ;;  %v423_v0 = vrot.slane %v422_v39, 1  ;;  %v1204_v28 = vmax.f32 %v511_v35, %v512_v44  ;;  %v514_v49 = vsel %vm92_vm0, %v238_v29, -inf }
 0x149   :  { %v1207_v48 = vmin.f32 %v600_v23, %v601_v27  ;;  %v425_v40 = vsel %vm92_vm0, %v388_v1, 0.0  ;;  %v603_v50 = vsel %vm92_vm0, %v238_v29, inf  ;;  %v396_v52 = vmul.f32 %v1175_v30, %v1175_v30 }
 0x14a   :  { %v1213_v53 = vadd.f32 %v423_v0, %v422_v39  ;;  %v349_v54 = vsel %vm92_vm0, %v1175_v30, 0.0  ;;  %v550_v55 = vsel %vm92_vm0, %v1175_v30, -inf  ;;  %v314_v47 = vsel %vm92_vm0, %v1179_v31, 0.0 }
 0x14b   :  { %v461_v57 = vsel %vm92_vm0, %v396_v52, 0.0  ;;  %v315_v61 = vadd.f32 %v314_v47, %v313_v60  ;;  %v389_v29 = vmul.f32 %v1179_v31, %v1179_v31  ;;  %v515_v63 = vsel %vm92_vm0, %v1179_v31, -inf }
 0x14c   :  { %v516_v7 = vmax.f32 %v514_v49, %v515_v63  ;;  %v604_v8 = vsel %vm92_vm0, %v1179_v31, inf  ;;  %v350_v5 = vsel %vm92_vm0, %v283_v15, 0.0  ;;  %v397_v11 = vmul.f32 %v283_v15, %v283_v15 }
 0x14d   :  { %v316_v12 = vrot.slane %v315_v61, 4  ;;  %v426_v13 = vsel %vm92_vm0, %v389_v29, 0.0  ;;  %v605_v14 = vmin.f32 %v603_v50, %v604_v8  ;;  %v351_v17 = vadd.f32 %v350_v5, %v349_v54 }
 0x14e   :  { %v427_v18 = vadd.f32 %v426_v13, %v425_v40  ;;  %v517_v32 = vrot.slane %v516_v7, 4  ;;  %v462_v35 = vsel %vm92_vm0, %v397_v11, 0.0  ;;  %v551_v23 = vsel %vm92_vm0, %v283_v15, -inf }
 0x14f   :  { %v639_v20 = vsel %vm92_vm0, %v1175_v30, inf  ;;  %v317_v38 = vadd.f32 %v316_v12, %v315_v61  ;;  %v606_v39 = vrot.slane %v605_v14, 4  ;;  %v463_v31 = vadd.f32 %v462_v35, %v461_v57 }
 0x150   :  { %v428_v44 = vrot.slane %v427_v18, 4  ;;  %v518_v27 = vmax.f32 %v516_v7, %v517_v32  ;;  %v552_v60 = vmax.f32 %v550_v55, %v551_v23  ;;  %v640_v1 = vsel %vm92_vm0, %v283_v15, inf }
 0x151   :  { %v318_v0 = vrot.slane %v317_v38, 2  ;;  %v607_v49 = vmin.f32 %v605_v14, %v606_v39  ;;  %v352_v40 = vrot.slane %v351_v17, 4  ;;  %v464_v50 = vrot.slane %v463_v31, 4 }
 0x152   :  { %v429_v52 = vadd.f32 %v428_v44, %v427_v18  ;;  %v519_v54 = vrot.slane %v518_v27, 2  ;;  %v553_v47 = vrot.slane %v552_v60, 4  ;;  %v641_v29 = vmin.f32 %v639_v20, %v640_v1 }
 0x153   :  { %v319_v63 = vadd.f32 %v318_v0, %v317_v38  ;;  %v608_v30 = vrot.slane %v607_v49, 2  ;;  %v441_v57 = vrot.slane %v1098_v26, 1  ;;  %v449_v55 = vadd.f32 %v448_v56, %v1136_v42 }
 0x154   :  { %v430_v61 = vrot.slane %v429_v52, 2  ;;  %v520_v15 = vmax.f32 %v518_v27, %v519_v54  ;;  %v554_v7 = vmax.f32 %v552_v60, %v553_v47  ;;  %v642_v8 = vrot.slane %v641_v29, 4 }
 0x155   :  { %v320_v5 = vrot.slane %v319_v63, 1  ;;  %v609_v11 = vmin.f32 %v607_v49, %v608_v30  ;;  %v353_v12 = vadd.f32 %v352_v40, %v351_v17  ;;  %v450_v13 = vrot.slane %v449_v55, 1 }
 0x156   :  { %v431_v14 = vadd.f32 %v430_v61, %v429_v52  ;;  %v521_v18 = vrot.slane %v520_v15, 1  ;;  %v555_v32 = vrot.slane %v554_v7, 2  ;;  %v442_v35 = vadd.f32 %v441_v57, %v1098_v26 }
 0x157   :  { %v321_v23 = vadd.f32 %v320_v5, %v319_v63  ;;  %v610_v20 = vrot.slane %v609_v11, 1  ;;  %v1240_v38 = vmin.f32 %v641_v29, %v642_v8  ;;  %v457_v42 = vrot.slane %v1194_v36, 2 }
 0x158   :  { %v432_v56 = vrot.slane %v431_v14, 1  ;;  %v451_v39 = vadd.f32 %v450_v13, %v449_v55  ;;  %v465_v44 = vadd.f32 %v464_v50, %v463_v31  ;;  %v478_v17 = vsel %vm366_vm1, %v1155_v9, %v1102_v33 }
 0x159   :  { %v522_v27 = vmax.f32 %v520_v15, %v521_v18  ;;  %v1246_v60 = vmin.f32 %v609_v11, %v610_v20  ;;  %v458_v1 = vadd.f32 %v457_v42, %v1194_v36  ;;  %v479_v26 = vsel %vm368_vm2, %v1213_v53, %v478_v17 }
 0x15a   :  { %v433_v0 = vadd.f32 %v432_v56, %v431_v14  ;;  %v466_v49 = vrot.slane %v465_v44, 2  ;;  %v338_v40 = vrot.slane %v1139_v51, 1  ;;  %v346_v31 = vadd.f32 %v345_v24, %v1189_v58 }
 0x15b   :  { %v459_v50 = vrot.slane %v458_v1, 1  ;;  %v330_v33 = vadd.f32 %v329_v22, %v1085_v6  ;;  %v354_v9 = vrot.slane %v353_v12, 2  ;;  %v367_v36 = vsel %vm366_vm1, %v1146_v59, %v1087_v19 }
 0x15c   :  { %v467_v52 = vadd.f32 %v466_v49, %v465_v44  ;;  %v480_v53 = vsel %vm370_vm3, %v433_v0, %v479_v26  ;;  %v339_v54 = vadd.f32 %v338_v40, %v1139_v51  ;;  %v347_v47 = vrot.slane %v346_v31, 1 }
 0x15d   :  { %v460_v29 = vadd.f32 %v459_v50, %v458_v1  ;;  %v481_v63 = vsel %vm372_vm4, %v442_v35, %v480_v53  ;;  %v355_v58 = vadd.f32 %v354_v9, %v353_v12  ;;  %v369_v24 = vsel %vm368_vm2, %v1202_v43, %v367_v36 }
 0x15e   :  { %v468_v30 = vrot.slane %v467_v52, 1  ;;  %v482_v6 = vsel %vm374_vm5, %v451_v39, %v481_v63  ;;  %v348_v22 = vadd.f32 %v347_v47, %v346_v31  ;;  %v371_v19 = vsel %vm370_vm3, %v321_v23, %v369_v24 }
 0x15f   :  { %v483_v59 = vsel %vm376_vm6, %v460_v29, %v482_v6  ;;  %v356_v57 = vrot.slane %v355_v58, 1  ;;  %v373_v51 = vsel %vm372_vm4, %v330_v33, %v371_v19  ;;  %v548_v55 = vrot.slane %v1198_v45, 1 }
 0x160   :  { %v469_v61 = vadd.f32 %v468_v30, %v467_v52  ;;  %v375_v43 = vsel %vm374_vm5, %v339_v54, %v373_v51  ;;  %v556_v15 = vmax.f32 %v554_v7, %v555_v32  ;;  %v567_v8 = vsel %vm366_vm1, %v1150_v2, %v1089_v21 }
 0x161   :  { %v357_v5 = vadd.f32 %v356_v57, %v355_v58  ;;  %v377_v11 = vsel %vm376_vm6, %v348_v22, %v375_v43  ;;  %v540_v12 = vmax.f32 %v1148_v62, %v539_v4  ;;  %v568_v13 = vsel %vm368_vm2, %v1204_v28, %v567_v8 }
 0x162   :  { %v484_v14 = vsel %vm378_vm7, %v469_v61, %v483_v59  ;;  %v549_v7 = vmax.f32 %v1198_v45, %v548_v55  ;;  %v557_v21 = vrot.slane %v556_v15, 1  ;;  %v569_v2 = vsel %vm370_vm3, %v522_v27, %v568_v13 }
 0x163   :  { %486 = vst.msk [vmem:[#allocation6] sm:$0xff] %vm92_vm0, %v484_v14  ;;  %v379_v18 = vsel %vm378_vm7, %v357_v5, %v377_v11  ;;  %v570_v32 = vsel %vm372_vm4, %v1109_v37, %v569_v2  ;;  %v628_v62 = vrot.slane %v1158_v10, 1  ;;  %v636_v4 = vmin.f32 %v1196_v16, %v635_v41 }
 0x164   :  { %824 = shalt.err (!%p821_p12)
}
 0x165   :  { %s825_s30 = scalar_lea.hbm %s1381_s4, 128 }
 0x166   :  { %p826_p13 = scmp.ne.s32.totalorder %s1381_s4, %s825_s30  ;;  %p829_p0 = scmp.lt.u32.totalorder %s825_s30, %s1381_s4 }
 0x168   :  { %p831_p1 = pnand %p829_p0, %p826_p13 }
 0x16a   :  { %834 = shalt.err (!%p831_p1)
}
 0x16b   :  { %684 = dma.vmem_to_hbm [thread:$0]  %s682_s22, 128, %s1381_s4, [#allocation7]   ;;  %381 = vst.msk [vmem:[#allocation5] sm:$0xff] %vm92_vm0, %v379_v18  ;;  %v558_v37 = vmax.f32 %v556_v15, %v557_v21  ;;  %v571_v16 = vsel %vm374_vm5, %v540_v12, %v570_v32  ;;  %v644_v45 = vrot.slane %v1240_v38, 2  ;;  %v656_v41 = vsel %vm366_vm1, %v1152_v3, %v1096_v25 }
 0x16c   :  { %s835_s13 = scalar_lea.vmem %s1282_s24, 128  ;;  %p840_p3 = scmp.lt.s32.totalorder %s1282_s24, %s1282_s24 }
 0x16d   :  { %p836_p2 = scmp.ne.s32.totalorder %s1282_s24, %s835_s13  ;;  %p841_p4 = scmp.lt.s32.totalorder %s835_s13, %s835_s13 }
 0x16f   :  { %p842_p5 = por %p841_p4, %p840_p3 }
 0x171   :  { %p843_p6 = pnand %p842_p5, %p836_p2 }
 0x173   :  { %846 = shalt.err (!%p843_p6)
}
 0x174   :  { %s847_s15 = scalar_lea.hbm %s1380_s3, 128 }
 0x175   :  { %p848_p7 = scmp.ne.s32.totalorder %s1380_s3, %s847_s15  ;;  %p851_p8 = scmp.lt.u32.totalorder %s847_s15, %s1380_s3 }
 0x177   :  { %p853_p9 = pnand %p851_p8, %p848_p7 }
 0x179   :  { %856 = shalt.err (!%p853_p9)
}
 0x17a   :  { %674 = dma.vmem_to_hbm [thread:$0]  %s1282_s24, 128, %s1380_s3, [#allocation4]   ;;  %v572_v25 = vsel %vm376_vm6, %v549_v7, %v571_v16  ;;  %v620_v3 = vmin.f32 %v1104_v34, %v619_v46  ;;  %v637_v28 = vrot.slane %v636_v4, 1  ;;  %v657_v35 = vsel %vm368_vm2, %v1207_v48, %v656_v41 }
 0x17b   :  { %v573_v23 = vsel %vm378_vm7, %v558_v37, %v572_v25  ;;  %v629_v20 = vmin.f32 %v1158_v10, %v628_v62  ;;  %v645_v42 = vmin.f32 %v1240_v38, %v644_v45  ;;  %v658_v56 = vsel %vm370_vm3, %v1246_v60, %v657_v35  ;;  %s916_s3 = smov [#allocation9]   ;;  %s857_s21 = scalar_lea.vmem %s1290_s26, 128 }
 0x17c   :  { %575 = vst.msk [vmem:[#allocation8] sm:$0xff] %vm92_vm0, %v573_v23  ;;  %v638_v39 = vmin.f32 %v636_v4, %v637_v28  ;;  %v659_v44 = vsel %vm372_vm4, %v620_v3, %v658_v56  ;;  %s701_s1 = sshll.u32 %s916_s3, 4  ;;  %p858_p10 = scmp.ne.s32.totalorder %s1290_s26, %s857_s21  ;;  %s702_s1 = int_to_ptr.vmem [resolvable:$true] %s701_s1 }
 0x17d   :  { %p862_p11 = scmp.lt.s32.totalorder %s1290_s26, %s1290_s26  ;;  %p863_p12 = scmp.lt.s32.totalorder %s857_s21, %s857_s21 }
 0x17f   :  { %p864_p13 = por %p863_p12, %p862_p11 }
 0x181   :  { %p865_p0 = pnand %p864_p13, %p858_p10 }
 0x183   :  { %868 = shalt.err (!%p865_p0)
}
 0x184   :  { %s869_s23 = scalar_lea.hbm %s1382_s5, 128 }
 0x185   :  { %p870_p1 = scmp.ne.s32.totalorder %s1382_s5, %s869_s23  ;;  %p873_p2 = scmp.lt.u32.totalorder %s869_s23, %s1382_s5 }
 0x187   :  { %p875_p3 = pnand %p873_p2, %p870_p1 }
 0x189   :  { %878 = shalt.err (!%p875_p3)
}
 0x18a   :  { %694 = dma.vmem_to_hbm [thread:$0]  %s1290_s26, 128, %s1382_s5, [#allocation7]   ;;  %v646_v34 = vrot.slane %v645_v42, 1  ;;  %v660_v46 = vsel %vm374_vm5, %v629_v20, %v659_v44 }
 0x18b   :  { %v661_v10 = vsel %vm376_vm6, %v638_v39, %v660_v46  ;;  %s879_s7 = scalar_lea.vmem %s702_s1, 128  ;;  %p884_p5 = scmp.lt.s32.totalorder %s702_s1, %s702_s1 }
 0x18c   :  { %v647_v48 = vmin.f32 %v645_v42, %v646_v34  ;;  %p880_p4 = scmp.ne.s32.totalorder %s702_s1, %s879_s7  ;;  %p885_p6 = scmp.lt.s32.totalorder %s879_s7, %s879_s7 }
 0x18e   :  { %v662_v38 = vsel %vm378_vm7, %v647_v48, %v661_v10  ;;  %p886_p7 = por %p885_p6, %p884_p5 }
 0x18f   :  { %664 = vst.msk [vmem:[#allocation9] sm:$0xff] %vm92_vm0, %v662_v38 }
 0x190   :  { %p887_p8 = pnand %p886_p7, %p880_p4 }
 0x192   :  { %890 = shalt.err (!%p887_p8)
}
 0x193   :  { %s891_s26 = scalar_lea.hbm %s1383_s6, 128 }
 0x194   :  { %p892_p9 = scmp.ne.s32.totalorder %s1383_s6, %s891_s26  ;;  %p895_p10 = scmp.lt.u32.totalorder %s891_s26, %s1383_s6 }
 0x196   :  { %p897_p11 = pnand %p895_p10, %p892_p9 }
 0x198   :  { %900 = shalt.err (!%p897_p11)
}
 0x199   :  { %704 = dma.vmem_to_hbm [thread:$0]  %s702_s1, 128, %s1383_s6, [#allocation10]  }
 0x19a   :  { %903 = dma.done.wait [#allocation4], 128  }
 0x19b   :  { %904 = vsyncadd [#allocation4], 4294967168 }
 0x19c   :  { %905 = dma.done.wait [#allocation7], 256  }
 0x19d   :  { %906 = vsyncadd [#allocation7], 4294967040 }
 0x19e   :  { %907 = dma.done.wait [#allocation10], 128  }
 0x19f   :  { %908 = vsyncadd [#allocation10], 4294967168 }
 0x1a0   :  { %717 = vsyncpa [#allocation3], 1 }
 0x1a1   :  { %718 = vsyncpa [#allocation4], 1 }
 0x1a2   :  { %719 = vsyncpa [#allocation7], 1 }
 0x1a3   :  { %720 = vsyncpa [#allocation10], 1 }

</bundles_post_ra>
